<compile_context>
chip_gen: v7x
topology: tpu7x:2x2x1
jax: 0.10.0
libtpu: 0.0.40
codegen_flags: <defaults>
</compile_context>

<pallas_src>
import math

import jax
import jax.numpy as jnp
from jax.experimental import pallas as pl
from jax.experimental.pallas import tpu as pltpu


def _interp_matrix(n_in, n_out):
    """Bilinear (align_corners=True) interpolation matrix of shape (n_out, n_in)."""
    i = jnp.arange(n_out, dtype=jnp.float32)
    if n_out > 1:
        src = i * (n_in - 1) / (n_out - 1)
    else:
        src = jnp.zeros_like(i)
    lo = jnp.clip(jnp.floor(src).astype(jnp.int32), 0, n_in - 1)
    hi = jnp.minimum(lo + 1, n_in - 1)
    frac = src - lo.astype(jnp.float32)
    A = jnp.zeros((n_out, n_in), jnp.float32)
    rows = jnp.arange(n_out)
    A = A.at[rows, lo].add(1.0 - frac)
    A = A.at[rows, hi].add(frac)
    return A


def _upblock_kernel(a_ref, x_ref, k_ref, b_ref, r_ref, o_ref):
    # a_ref: (1, TH+2, h_in)       bf16  per-tile slice of the padded row-interp matrix
    # x_ref: (1, h_in, w_in*cin)   bf16  input feature map (one batch elem), lane-dense (w, ci)
    # k_ref: (3, w_in*cin, W*cp)   bf16  folded (width-interp x kx-tap x conv-weight) operators
    # b_ref: (1, W*cp)             f32   bias tiled along x (padded channels zeroed)
    # r_ref: (1, TH, W*cp)         bf16  residual tile (lane-dense slab)
    # o_ref: (1, TH, W*cp)         f32   output tile
    TH = o_ref.shape[1]

    # (1) Height pass: bilinear row upsample (incl. the +/-1 ky halo rows), one MXU op.
    t_rows = jnp.dot(a_ref[0], x_ref[0],
                     preferred_element_type=jnp.float32).astype(jnp.bfloat16)   # (TH+2, w_in*cin)

    # (2) Width upsample + 3x3 conv fused: three accumulated bf16 matmuls (one per ky tap),
    #     f32 accumulation.  No im2col relayout, no concat, no Kronecker operator.
    acc = jnp.dot(t_rows[0:TH], k_ref[0], preferred_element_type=jnp.float32)
    acc = acc + jnp.dot(t_rows[1:TH + 1], k_ref[1], preferred_element_type=jnp.float32)
    acc = acc + jnp.dot(t_rows[2:TH + 2], k_ref[2], preferred_element_type=jnp.float32)

    # (3) Bias + residual add, single lane-dense store.
    out = acc + b_ref[...] + r_ref[0].astype(jnp.float32)
    o_ref[0] = out.astype(o_ref.dtype)


def _vmem_budget_bytes():
    """~60% of this generation's physical VMEM (64 MiB on v7x, 128 MiB on v5e/v6e)."""
    try:
        cap = getattr(pltpu.get_tpu_info(), "vmem_capacity_bytes", None)
        if cap:
            return int(0.6 * cap)
    except Exception:
        pass
    return 48 * 1024 * 1024      # conservative default: fits under v7x's 64 MiB physical VMEM


def _pick_tile_h(H, h_in, wc, wcp, n_batch, k_bufs, budget):
    """Largest tile height whose per-step live set fits the VMEM budget, keeping >= 2
    parallel grid steps when possible so both TensorCores of a 2-TC chip get work."""
    def est(th):
        a = (th + 2) * h_in * 2 * 2                    # A tile, bf16, double buffered
        x = h_in * wc * 2 * 2                          # whole input image, bf16, double buffered
        k = 3 * wc * wcp * 2 * k_bufs                  # folded operators, bf16
        b = wcp * 4 * k_bufs                           # bias row
        r = th * wcp * 2 * 2                           # residual tile, bf16
        o = th * wcp * 4 * 2                           # output tile, f32
        tmp = (th + 2) * wc * (4 + 2) + th * wcp * 4   # t_rows (f32 + bf16) + accumulator
        return int(1.3 * (a + x + k + b + r + o + tmp))

    cands = [d for d in range(H, 0, -1) if H % d == 0 and (d % 16 == 0 or d == H)]
    smallest = cands[-1]
    for th in cands:                                   # descending: biggest fitting tile wins
        if est(th) > budget and th != smallest:
            continue
        if n_batch * (H // th) < 2 and th != smallest:
            continue                                   # keep the grid >= 2 parallel steps
        return th, est(th)
    return smallest, est(smallest)


def make_upblock(weight, bias, *, batch, h_in, w_in, single_buffer_invariants=True):
    """Precompute the folded operators once (hoisted out of the per-call path) and return
    jitted (apply_nchw, apply_nhwc) functions implementing UpBlock.forward."""
    cout, cin, kh, kw = weight.shape
    assert (kh, kw) == (3, 3)
    H, W = 2 * h_in, 2 * w_in
    wc = w_in * cin

    # Pad cout so the output/residual lane dim (W * cout_p) is a multiple of 128
    # -> unmasked vector stores.  At production sizes (W % 128 == 0) this is a no-op.
    lane_q = 128 // math.gcd(W, 128)
    cout_p = ((cout + lane_q - 1) // lane_q) * lane_q
    wcp = W * cout_p

    # ---- host-side operator folding (done once per module) -----------------------------
    A_h = _interp_matrix(h_in, H)                           # (H, h_in)
    A_w = _interp_matrix(w_in, W)                           # (W, w_in)
    A_hp = jnp.pad(A_h, ((1, 1), (0, 0)))                   # conv zero-pad rows baked in
    P = jnp.pad(A_w, ((1, 1), (0, 0)))                      # (W+2, w_in), zero pad cols baked in

    # K[ky, w*cin+ci, x*cout_p+co] = sum_kx P[x+kx, w] * weight[co, ci, ky, kx]
    taps = jnp.stack([P[kx:kx + W, :] for kx in range(3)], axis=0)        # (kx, x, w)
    wk = jnp.transpose(weight, (2, 3, 1, 0))                              # (ky, kx, ci, co)
    K = jnp.einsum('kxw,ykio->ywixo', taps, wk)                           # (ky, w, ci, x, co)
    K = jnp.pad(K, ((0, 0), (0, 0), (0, 0), (0, 0), (0, cout_p - cout)))
    K = K.reshape(3, wc, wcp).astype(jnp.bfloat16)
    # TODO(synk): for large cin*cout the folded K no longer fits VMEM; switch to the
    # roll/lerp width pass + a single im2col matmul (review option (a)) in that regime.

    b_row = jnp.tile(jnp.pad(bias.astype(jnp.float32), (0, cout_p - cout)), W).reshape(1, wcp)

    # ---- tiling: largest tile_h that fits this generation's VMEM budget ----------------
    k_bufs = 1 if single_buffer_invariants else 2
    budget = _vmem_budget_bytes()
    tile_h, live_bytes = _pick_tile_h(H, h_in, wc, wcp, batch, k_bufs, budget)
    nt = H // tile_h

    # Per-row-tile slices of A_hp (tiles overlap by the 3x3 conv's 2-row ky halo).
    a_tiles = jnp.stack(
        [A_hp[t * tile_h: t * tile_h + tile_h + 2] for t in range(nt)], axis=0
    ).astype(jnp.bfloat16)                                               # (nt, tile_h+2, h_in)
    # TODO(synk): for very large images, halo-tile the input x along h with a manual-DMA
    # (pl.ANY) fetch instead of keeping the whole (h_in, w_in*cin) image resident per batch.

    def inv_spec(shape, index_map):
        # Grid-invariant operands: single-buffer them (perf feedback); fall back cleanly
        # if this JAX build does not expose pipeline_mode / pl.Buffered.
        if single_buffer_invariants:
            try:
                return pl.BlockSpec(shape, index_map, pipeline_mode=pl.Buffered(1))
            except (TypeError, AttributeError):
                pass
        return pl.BlockSpec(shape, index_map)

    call = pl.pallas_call(
        _upblock_kernel,
        out_shape=jax.ShapeDtypeStruct((batch, H, wcp), jnp.float32),
        grid=(batch, nt),
        in_specs=[
            pl.BlockSpec((1, tile_h + 2, h_in), lambda b, t: (t, 0, 0)),   # A row tiles
            pl.BlockSpec((1, h_in, wc), lambda b, t: (b, 0, 0)),           # input image (bf16)
            inv_spec((3, wc, wcp), lambda b, t: (0, 0, 0)),                # folded operators
            inv_spec((1, wcp), lambda b, t: (0, 0)),                       # bias row
            pl.BlockSpec((1, tile_h, wcp), lambda b, t: (b, t, 0)),        # residual tile (bf16)
        ],
        out_specs=pl.BlockSpec((1, tile_h, wcp), lambda b, t: (b, t, 0)),
        compiler_params=pltpu.CompilerParams(
            dimension_semantics=("parallel", "parallel"),   # batch & row tiles independent
            vmem_limit_bytes=int(max(budget, live_bytes)),
        ),
    )

    def apply_nhwc(x_before_nhwc, x_after_nhwc):
        """Channels-last fast path: no NCHW<->NHWC HBM transposes."""
        x_a = x_after_nhwc.reshape(batch, h_in, wc).astype(jnp.bfloat16)
        r = x_before_nhwc
        if cout_p != cout:
            r = jnp.pad(r, ((0, 0), (0, 0), (0, 0), (0, cout_p - cout)))
        r = r.reshape(batch, H, wcp).astype(jnp.bfloat16)
        out = call(a_tiles, x_a, K, b_row, r)
        return out.reshape(batch, H, W, cout_p)[..., :cout]

    def apply_nchw(x_before, x_after):
        """Drop-in NCHW adapter matching the PyTorch module layout.  The transposes here
        are the only extra HBM passes; use apply_nhwc to avoid them entirely."""
        out = apply_nhwc(jnp.transpose(x_before, (0, 2, 3, 1)),
                         jnp.transpose(x_after, (0, 2, 3, 1)))
        return jnp.transpose(out, (0, 3, 1, 2)).astype(x_before.dtype)

    return jax.jit(apply_nchw), jax.jit(apply_nhwc)


def upblock_reference(x_before, x_after, weight, bias):
    """Pure-JAX reference (NCHW) matching nn.UpsamplingBilinear2d(2) + nn.Conv2d(3,1,pad=1)."""
    _, _, h_in, w_in = x_after.shape
    H, W = 2 * h_in, 2 * w_in
    A_h = _interp_matrix(h_in, H)
    A_w = _interp_matrix(w_in, W)
    up = jnp.einsum('Hh,nchw->ncHw', A_h, x_after)
    up = jnp.einsum('Ww,ncHw->ncHW', A_w, up)
    conv = jax.lax.conv_general_dilated(
        up, weight, window_strides=(1, 1), padding=((1, 1), (1, 1)),
        dimension_numbers=('NCHW', 'OIHW', 'NCHW'))
    return x_before + conv + bias.reshape(1, -1, 1, 1)


if __name__ == "__main__":
    key = jax.random.PRNGKey(0)
    k1, k2, k3, k4 = jax.random.split(key, 4)

    N, cin, cout = 2, 4, 4
    h_in = w_in = 8
    H, W = 2 * h_in, 2 * w_in

    x_after = jax.random.normal(k1, (N, cin, h_in, w_in), jnp.float32)     # pre-upsample features
    x_before = jax.random.normal(k2, (N, cout, H, W), jnp.float32)         # residual
    bound = 1.0 / (cin * 3 * 3) ** 0.5
    weight = jax.random.uniform(k3, (cout, cin, 3, 3), jnp.float32, -bound, bound)
    bias = jax.random.uniform(k4, (cout,), jnp.float32, -bound, bound)

    try:
        apply_nchw, _ = make_upblock(weight, bias, batch=N, h_in=h_in, w_in=w_in,
                                     single_buffer_invariants=True)
        out = jax.block_until_ready(apply_nchw(x_before, x_after))
    except Exception:
        # pl.Buffered(1) single-buffering rejected by this build: retry with the default
        # double-buffered pipeline (perf-only difference, identical math).
        apply_nchw, _ = make_upblock(weight, bias, batch=N, h_in=h_in, w_in=w_in,
                                     single_buffer_invariants=False)
        out = jax.block_until_ready(apply_nchw(x_before, x_after))

    ref = jax.block_until_ready(upblock_reference(x_before, x_after, weight, bias))

    assert out.shape == (N, cout, H, W), out.shape
    max_err = float(jnp.max(jnp.abs(out - ref)))
    # bf16 streaming + bf16 MXU operands (f32 accumulation) -> loosened tolerance.
    assert jnp.allclose(out, ref, atol=5e-2, rtol=5e-2), f"max abs err {max_err}"
    print("KERNEL_OK")
</pallas_src>

<mosaic_0001>
module attributes {stable_mosaic.version = 11 : i64} {
  func.func @_upblock_kernel(%arg0: i32, %arg1: i32, %arg2: memref<1x18x8xbf16, #tpu.memory_space<vmem>>, %arg3: memref<1x8x32xbf16, #tpu.memory_space<vmem>>, %arg4: memref<3x32x128xbf16, #tpu.memory_space<vmem>>, %arg5: memref<1x128xf32, #tpu.memory_space<vmem>>, %arg6: memref<1x16x128xbf16, #tpu.memory_space<vmem>>, %arg7: memref<1x16x128xf32, #tpu.memory_space<vmem>>) attributes {dimension_semantics = [#tpu.dimension_semantics<parallel>, #tpu.dimension_semantics<parallel>], iteration_bounds = array<i64: 2, 1>, scalar_prefetch = 0 : i64, scratch_operands = 0 : i64, tpu.core_type = #tpu.core_type<tc>, window_params = [{transform_indices = @transform_0, window_bounds = array<i64: 1, 18, 8>}, {transform_indices = @transform_1, window_bounds = array<i64: 1, 8, 32>}, {pipeline_mode = #tpu.pipeline_mode<synchronous>, transform_indices = @transform_2, window_bounds = array<i64: 3, 32, 128>}, {pipeline_mode = #tpu.pipeline_mode<synchronous>, transform_indices = @transform_3, window_bounds = array<i64: 1, 128>}, {transform_indices = @transform_4, window_bounds = array<i64: 1, 16, 128>}, {transform_indices = @transform_5, window_bounds = array<i64: 1, 16, 128>}]} {
    %c0 = arith.constant 0 : index
    %c0_0 = arith.constant 0 : index
    %c0_1 = arith.constant 0 : index
    %0 = vector.load %arg2[%c0, %c0_0, %c0_1] : memref<1x18x8xbf16, #tpu.memory_space<vmem>>, vector<1x18x8xbf16>
    %1 = vector.shape_cast %0 : vector<1x18x8xbf16> to vector<18x8xbf16>
    %c0_2 = arith.constant 0 : index
    %c0_3 = arith.constant 0 : index
    %c0_4 = arith.constant 0 : index
    %2 = vector.load %arg3[%c0_2, %c0_3, %c0_4] : memref<1x8x32xbf16, #tpu.memory_space<vmem>>, vector<1x8x32xbf16>
    %3 = vector.shape_cast %2 : vector<1x8x32xbf16> to vector<8x32xbf16>
    %cst = arith.constant dense<0.000000e+00> : vector<18x32xf32>
    %4 = tpu.matmul %1, %3, %cst {dimension_numbers = #tpu.dot_dimension_numbers<[1], [0], [0], [1], [0, 0, 1, 1], [], []>} : vector<18x8xbf16>, vector<8x32xbf16>, vector<18x32xf32> -> vector<18x32xf32>
    %5 = arith.truncf %4 : vector<18x32xf32> to vector<18x32xbf16>
    %6 = vector.extract_strided_slice %5 {offsets = [0, 0], sizes = [16, 32], strides = [1, 1]} : vector<18x32xbf16> to vector<16x32xbf16>
    %c0_5 = arith.constant 0 : index
    %c0_6 = arith.constant 0 : index
    %c0_7 = arith.constant 0 : index
    %7 = vector.load %arg4[%c0_5, %c0_6, %c0_7] : memref<3x32x128xbf16, #tpu.memory_space<vmem>>, vector<1x32x128xbf16>
    %8 = vector.shape_cast %7 : vector<1x32x128xbf16> to vector<32x128xbf16>
    %cst_8 = arith.constant dense<0.000000e+00> : vector<16x128xf32>
    %9 = tpu.matmul %6, %8, %cst_8 {dimension_numbers = #tpu.dot_dimension_numbers<[1], [0], [0], [1], [0, 0, 1, 1], [], []>} : vector<16x32xbf16>, vector<32x128xbf16>, vector<16x128xf32> -> vector<16x128xf32>
    %10 = vector.extract_strided_slice %5 {offsets = [1, 0], sizes = [16, 32], strides = [1, 1]} : vector<18x32xbf16> to vector<16x32xbf16>
    %c1 = arith.constant 1 : index
    %c0_9 = arith.constant 0 : index
    %c0_10 = arith.constant 0 : index
    %11 = vector.load %arg4[%c1, %c0_9, %c0_10] : memref<3x32x128xbf16, #tpu.memory_space<vmem>>, vector<1x32x128xbf16>
    %12 = vector.shape_cast %11 : vector<1x32x128xbf16> to vector<32x128xbf16>
    %cst_11 = arith.constant dense<0.000000e+00> : vector<16x128xf32>
    %13 = tpu.matmul %10, %12, %cst_11 {dimension_numbers = #tpu.dot_dimension_numbers<[1], [0], [0], [1], [0, 0, 1, 1], [], []>} : vector<16x32xbf16>, vector<32x128xbf16>, vector<16x128xf32> -> vector<16x128xf32>
    %14 = arith.addf %9, %13 : vector<16x128xf32>
    %15 = vector.extract_strided_slice %5 {offsets = [2, 0], sizes = [16, 32], strides = [1, 1]} : vector<18x32xbf16> to vector<16x32xbf16>
    %c2 = arith.constant 2 : index
    %c0_12 = arith.constant 0 : index
    %c0_13 = arith.constant 0 : index
    %16 = vector.load %arg4[%c2, %c0_12, %c0_13] : memref<3x32x128xbf16, #tpu.memory_space<vmem>>, vector<1x32x128xbf16>
    %17 = vector.shape_cast %16 : vector<1x32x128xbf16> to vector<32x128xbf16>
    %cst_14 = arith.constant dense<0.000000e+00> : vector<16x128xf32>
    %18 = tpu.matmul %15, %17, %cst_14 {dimension_numbers = #tpu.dot_dimension_numbers<[1], [0], [0], [1], [0, 0, 1, 1], [], []>} : vector<16x32xbf16>, vector<32x128xbf16>, vector<16x128xf32> -> vector<16x128xf32>
    %19 = arith.addf %14, %18 : vector<16x128xf32>
    %c0_15 = arith.constant 0 : index
    %c0_16 = arith.constant 0 : index
    %20 = vector.load %arg5[%c0_15, %c0_16] : memref<1x128xf32, #tpu.memory_space<vmem>>, vector<1x128xf32>
    %21 = vector.broadcast %20 : vector<1x128xf32> to vector<16x128xf32>
    %22 = arith.addf %19, %21 : vector<16x128xf32>
    %c0_17 = arith.constant 0 : index
    %c0_18 = arith.constant 0 : index
    %c0_19 = arith.constant 0 : index
    %23 = vector.load %arg6[%c0_17, %c0_18, %c0_19] : memref<1x16x128xbf16, #tpu.memory_space<vmem>>, vector<1x16x128xbf16>
    %24 = vector.shape_cast %23 : vector<1x16x128xbf16> to vector<16x128xbf16>
    %25 = arith.extf %24 : vector<16x128xbf16> to vector<16x128xf32>
    %26 = arith.addf %22, %25 : vector<16x128xf32>
    %c0_20 = arith.constant 0 : index
    %c0_21 = arith.constant 0 : index
    %c0_22 = arith.constant 0 : index
    %27 = vector.load %arg7[%c0_20, %c0_21, %c0_22] : memref<1x16x128xf32, #tpu.memory_space<vmem>>, vector<1x16x128xf32>
    %28 = vector.shape_cast %27 : vector<1x16x128xf32> to vector<16x128xf32>
    %29 = vector.shape_cast %26 : vector<16x128xf32> to vector<1x16x128xf32>
    tpu.vector_store %arg7[%c0_20, %c0_21, %c0_22], %29 {strides = array<i32>} : memref<1x16x128xf32, #tpu.memory_space<vmem>>, vector<1x16x128xf32>,
    return
  }
  func.func @transform_0(%arg0: i32, %arg1: i32) -> (i32, i32, i32) {
    %c0_i32 = arith.constant 0 : i32
    %c0_i32_0 = arith.constant 0 : i32
    %c0_i32_1 = arith.constant 0 : i32
    return %arg1, %c0_i32, %c0_i32_0 : i32, i32, i32
  }
  func.func @transform_1(%arg0: i32, %arg1: i32) -> (i32, i32, i32) {
    %c0_i32 = arith.constant 0 : i32
    %c0_i32_0 = arith.constant 0 : i32
    %c0_i32_1 = arith.constant 0 : i32
    return %arg0, %c0_i32, %c0_i32_0 : i32, i32, i32
  }
  func.func @transform_2(%arg0: i32, %arg1: i32) -> (i32, i32, i32) {
    %c0_i32 = arith.constant 0 : i32
    %c0_i32_0 = arith.constant 0 : i32
    %c0_i32_1 = arith.constant 0 : i32
    %c0_i32_2 = arith.constant 0 : i32
    return %c0_i32, %c0_i32_0, %c0_i32_1 : i32, i32, i32
  }
  func.func @transform_3(%arg0: i32, %arg1: i32) -> (i32, i32) {
    %c0_i32 = arith.constant 0 : i32
    %c0_i32_0 = arith.constant 0 : i32
    %c0_i32_1 = arith.constant 0 : i32
    return %c0_i32, %c0_i32_0 : i32, i32
  }
  func.func @transform_4(%arg0: i32, %arg1: i32) -> (i32, i32, i32) {
    %c0_i32 = arith.constant 0 : i32
    %c0_i32_0 = arith.constant 0 : i32
    return %arg0, %arg1, %c0_i32 : i32, i32, i32
  }
  func.func @transform_5(%arg0: i32, %arg1: i32) -> (i32, i32, i32) {
    %c0_i32 = arith.constant 0 : i32
    %c0_i32_0 = arith.constant 0 : i32
    return %arg0, %arg1, %c0_i32 : i32, i32, i32
  }
}

module attributes {stable_mosaic.version = 11 : i64} {
  func.func @_upblock_kernel(%arg0: i32, %arg1: i32, %arg2: memref<1x18x8xbf16, #tpu.memory_space<vmem>>, %arg3: memref<1x8x32xbf16, #tpu.memory_space<vmem>>, %arg4: memref<3x32x128xbf16, #tpu.memory_space<vmem>>, %arg5: memref<1x128xf32, #tpu.memory_space<vmem>>, %arg6: memref<1x16x128xbf16, #tpu.memory_space<vmem>>, %arg7: memref<1x16x128xf32, #tpu.memory_space<vmem>>) attributes {dimension_semantics = [#tpu.dimension_semantics<parallel>, #tpu.dimension_semantics<parallel>], iteration_bounds = array<i64: 2, 1>, scalar_prefetch = 0 : i64, scratch_operands = 0 : i64, tpu.core_type = #tpu.core_type<tc>, window_params = [{transform_indices = @transform_0, window_bounds = array<i64: 1, 18, 8>}, {transform_indices = @transform_1, window_bounds = array<i64: 1, 8, 32>}, {pipeline_mode = #tpu.pipeline_mode<synchronous>, transform_indices = @transform_2, window_bounds = array<i64: 3, 32, 128>}, {pipeline_mode = #tpu.pipeline_mode<synchronous>, transform_indices = @transform_3, window_bounds = array<i64: 1, 128>}, {transform_indices = @transform_4, window_bounds = array<i64: 1, 16, 128>}, {transform_indices = @transform_5, window_bounds = array<i64: 1, 16, 128>}]} {
    %c0 = arith.constant 0 : index
    %c0_0 = arith.constant 0 : index
    %c0_1 = arith.constant 0 : index
    %0 = vector.load %arg2[%c0, %c0_0, %c0_1] : memref<1x18x8xbf16, #tpu.memory_space<vmem>>, vector<1x18x8xbf16>
    %1 = vector.shape_cast %0 : vector<1x18x8xbf16> to vector<18x8xbf16>
    %c0_2 = arith.constant 0 : index
    %c0_3 = arith.constant 0 : index
    %c0_4 = arith.constant 0 : index
    %2 = vector.load %arg3[%c0_2, %c0_3, %c0_4] : memref<1x8x32xbf16, #tpu.memory_space<vmem>>, vector<1x8x32xbf16>
    %3 = vector.shape_cast %2 : vector<1x8x32xbf16> to vector<8x32xbf16>
    %cst = arith.constant dense<0.000000e+00> : vector<18x32xf32>
    %4 = tpu.matmul %1, %3, %cst {dimension_numbers = #tpu.dot_dimension_numbers<[1], [0], [0], [1], [0, 0, 1, 1], [], []>} : vector<18x8xbf16>, vector<8x32xbf16>, vector<18x32xf32> -> vector<18x32xf32>
    %5 = arith.truncf %4 : vector<18x32xf32> to vector<18x32xbf16>
    %6 = vector.extract_strided_slice %5 {offsets = [0, 0], sizes = [16, 32], strides = [1, 1]} : vector<18x32xbf16> to vector<16x32xbf16>
    %c0_5 = arith.constant 0 : index
    %c0_6 = arith.constant 0 : index
    %c0_7 = arith.constant 0 : index
    %7 = vector.load %arg4[%c0_5, %c0_6, %c0_7] : memref<3x32x128xbf16, #tpu.memory_space<vmem>>, vector<1x32x128xbf16>
    %8 = vector.shape_cast %7 : vector<1x32x128xbf16> to vector<32x128xbf16>
    %cst_8 = arith.constant dense<0.000000e+00> : vector<16x128xf32>
    %9 = tpu.matmul %6, %8, %cst_8 {dimension_numbers = #tpu.dot_dimension_numbers<[1], [0], [0], [1], [0, 0, 1, 1], [], []>} : vector<16x32xbf16>, vector<32x128xbf16>, vector<16x128xf32> -> vector<16x128xf32>
    %10 = vector.extract_strided_slice %5 {offsets = [1, 0], sizes = [16, 32], strides = [1, 1]} : vector<18x32xbf16> to vector<16x32xbf16>
    %c1 = arith.constant 1 : index
    %c0_9 = arith.constant 0 : index
    %c0_10 = arith.constant 0 : index
    %11 = vector.load %arg4[%c1, %c0_9, %c0_10] : memref<3x32x128xbf16, #tpu.memory_space<vmem>>, vector<1x32x128xbf16>
    %12 = vector.shape_cast %11 : vector<1x32x128xbf16> to vector<32x128xbf16>
    %cst_11 = arith.constant dense<0.000000e+00> : vector<16x128xf32>
    %13 = tpu.matmul %10, %12, %cst_11 {dimension_numbers = #tpu.dot_dimension_numbers<[1], [0], [0], [1], [0, 0, 1, 1], [], []>} : vector<16x32xbf16>, vector<32x128xbf16>, vector<16x128xf32> -> vector<16x128xf32>
    %14 = arith.addf %9, %13 : vector<16x128xf32>
    %15 = vector.extract_strided_slice %5 {offsets = [2, 0], sizes = [16, 32], strides = [1, 1]} : vector<18x32xbf16> to vector<16x32xbf16>
    %c2 = arith.constant 2 : index
    %c0_12 = arith.constant 0 : index
    %c0_13 = arith.constant 0 : index
    %16 = vector.load %arg4[%c2, %c0_12, %c0_13] : memref<3x32x128xbf16, #tpu.memory_space<vmem>>, vector<1x32x128xbf16>
    %17 = vector.shape_cast %16 : vector<1x32x128xbf16> to vector<32x128xbf16>
    %cst_14 = arith.constant dense<0.000000e+00> : vector<16x128xf32>
    %18 = tpu.matmul %15, %17, %cst_14 {dimension_numbers = #tpu.dot_dimension_numbers<[1], [0], [0], [1], [0, 0, 1, 1], [], []>} : vector<16x32xbf16>, vector<32x128xbf16>, vector<16x128xf32> -> vector<16x128xf32>
    %19 = arith.addf %14, %18 : vector<16x128xf32>
    %c0_15 = arith.constant 0 : index
    %c0_16 = arith.constant 0 : index
    %20 = vector.load %arg5[%c0_15, %c0_16] : memref<1x128xf32, #tpu.memory_space<vmem>>, vector<1x128xf32>
    %21 = vector.broadcast %20 : vector<1x128xf32> to vector<16x128xf32>
    %22 = arith.addf %19, %21 : vector<16x128xf32>
    %c0_17 = arith.constant 0 : index
    %c0_18 = arith.constant 0 : index
    %c0_19 = arith.constant 0 : index
    %23 = vector.load %arg6[%c0_17, %c0_18, %c0_19] : memref<1x16x128xbf16, #tpu.memory_space<vmem>>, vector<1x16x128xbf16>
    %24 = vector.shape_cast %23 : vector<1x16x128xbf16> to vector<16x128xbf16>
    %25 = arith.extf %24 : vector<16x128xbf16> to vector<16x128xf32>
    %26 = arith.addf %22, %25 : vector<16x128xf32>
    %c0_20 = arith.constant 0 : index
    %c0_21 = arith.constant 0 : index
    %c0_22 = arith.constant 0 : index
    %27 = vector.load %arg7[%c0_20, %c0_21, %c0_22] : memref<1x16x128xf32, #tpu.memory_space<vmem>>, vector<1x16x128xf32>
    %28 = vector.shape_cast %27 : vector<1x16x128xf32> to vector<16x128xf32>
    %29 = vector.shape_cast %26 : vector<16x128xf32> to vector<1x16x128xf32>
    tpu.vector_store %arg7[%c0_20, %c0_21, %c0_22], %29 {strides = array<i32>} : memref<1x16x128xf32, #tpu.memory_space<vmem>>, vector<1x16x128xf32>,
    return
  }
  func.func @transform_0(%arg0: i32, %arg1: i32) -> (i32, i32, i32) {
    %c0_i32 = arith.constant 0 : i32
    %c0_i32_0 = arith.constant 0 : i32
    %c0_i32_1 = arith.constant 0 : i32
    return %arg1, %c0_i32, %c0_i32_0 : i32, i32, i32
  }
  func.func @transform_1(%arg0: i32, %arg1: i32) -> (i32, i32, i32) {
    %c0_i32 = arith.constant 0 : i32
    %c0_i32_0 = arith.constant 0 : i32
    %c0_i32_1 = arith.constant 0 : i32
    return %arg0, %c0_i32, %c0_i32_0 : i32, i32, i32
  }
  func.func @transform_2(%arg0: i32, %arg1: i32) -> (i32, i32, i32) {
    %c0_i32 = arith.constant 0 : i32
    %c0_i32_0 = arith.constant 0 : i32
    %c0_i32_1 = arith.constant 0 : i32
    %c0_i32_2 = arith.constant 0 : i32
    return %c0_i32, %c0_i32_0, %c0_i32_1 : i32, i32, i32
  }
  func.func @transform_3(%arg0: i32, %arg1: i32) -> (i32, i32) {
    %c0_i32 = arith.constant 0 : i32
    %c0_i32_0 = arith.constant 0 : i32
    %c0_i32_1 = arith.constant 0 : i32
    return %c0_i32, %c0_i32_0 : i32, i32
  }
  func.func @transform_4(%arg0: i32, %arg1: i32) -> (i32, i32, i32) {
    %c0_i32 = arith.constant 0 : i32
    %c0_i32_0 = arith.constant 0 : i32
    return %arg0, %arg1, %c0_i32 : i32, i32, i32
  }
  func.func @transform_5(%arg0: i32, %arg1: i32) -> (i32, i32, i32) {
    %c0_i32 = arith.constant 0 : i32
    %c0_i32_0 = arith.constant 0 : i32
    return %arg0, %arg1, %c0_i32 : i32, i32, i32
  }
}

</mosaic_0001>

<bundles_post_ra>
// kernel: apply_nchw.1
= control target key start
LH: loop header
LB: loop body
LE: loop exit
PB: predicated region body
PF: predicated region fallthrough
CT: control target
= control target key end

     0   :  { %s883_s18 = smov 0   ;;  %s885_s19 = smov 0   ;;  %s957_s0 = inlined_call_operand.vmem [shape: bf16[1,18,8], index: 0, kind: input, shape index: {}]   ;;  %s958_s1 = inlined_call_operand.vmem [shape: bf16[2,8,32], index: 1, kind: input, shape index: {}]   ;;  %s959_s2 = inlined_call_operand.vmem [shape: bf16[3,32,128], index: 2, kind: input, shape index: {}]   ;;  %s960_s3 = inlined_call_operand.vmem [shape: f32[1,128], index: 3, kind: input, shape index: {}]   ;;  %s961_s4 = inlined_call_operand.vmem [shape: bf16[2,16,128], index: 4, kind: input, shape index: {}]   ;;  %s962_s5 = inlined_call_operand.vmem [shape: f32[2,16,128], index: 5, kind: output, shape index: {}]  }
   0x1   :  { %s887_s20 = smov 0  }
   0x2 LB: > { %s27_s21 = sadd.s32 1, %s845_s19  ;;  %p714_p0 = scmp.ge.s32.totalorder %s849_s20, 1  ;;  %s849_s20 = sphi %s887_s20, %s15_s20   ;;  %s845_s19 = sphi %s885_s19, %s964_s19   ;;  %s841_s18 = sphi %s883_s18, %s963_s18  }
   0x3   : > { %p29_p1 = scmp.ge.s32.totalorder %s27_s21, 2  ;;  %p227_p2 = scmp.lt.s32.totalorder %s849_s20, 3 }
   0x5   : > { %s966_s21 = smov (%p29_p1, %s27_s21), 0  ;;  %p228_p3 = pnand %p714_p0, %p227_p2 }
   0x6   : > { %p277_p4 = scmp.lt.s32.totalorder (!%p228_p3), %s841_s18, 1  ;;  %v819_v0 = vld [vmem:[%s957_s0] sm:$0xff] (!%p228_p3)   ;;  %vm314_vm0 = vcmask (!%p228_p3), 64512   ;;  %v851_v1 = vmov (!%p228_p3), 0.0   ;;  %vm321_vm1 = vcmask (!%p228_p3), 1043456   ;;  %v822_v6 = vld [vmem:[%s959_s2 + $0x8] sm:$0xff] (!%p228_p3)  }
   0x7   : > { %231 = sbr.rel (%p228_p3) target bundleno = 475 (0x1db), region = 40  ;;  %768 = vmatprep.subr.bf16.mxu1 (!%p228_p3), %v851_v1  ;;  %764 = vmatprep.mubr.msk.bf16.mxu0 (!%p228_p3), %vm314_vm0, %v819_v0  ;;  %v820_v4 = vld [vmem:[%s957_s0 + $0x8] ss:$0 sps:$4 sm:$0x11] (!%p228_p3)   ;;  %v821_v5 = vld [vmem:[%s959_s2] sm:$0xff] (!%p228_p3)   ;;  %v823_v7 = vld [vmem:[%s959_s2 + $0x10] sm:$0xff] (!%p228_p3)  }
   0x8   : > { %vm852_vm2 = vmmov (!%p228_p3), 0   ;;  %769 = vmatpush3.bf16.msra.mxu1 (!%p228_p3), %v823_v7  ;;  %v824_v8 = vld [vmem:[%s959_s2 + $0x18] sm:$0xff] (!%p228_p3)   ;;  %vm409_vm3 = vcmask (!%p228_p3), 261120   ;;  %vm516_vm4 = vcmask (!%p228_p3), 1046528   ;;  %vm384_vm5 = vsmask.f32 (!%p228_p3), 7424 }
   0x9   : > { %772 = vmatprep.mubr.msk.bf16.mxu1 (!%p228_p3), %vm852_vm2, %v851_v1  ;;  %770 = vmatprep.subr.bf16.mxu1 (!%p228_p3), %v851_v1  ;;  %v825_v24 = vld [vmem:[%s959_s2 + $0x20] sm:$0xff] (!%p228_p3)   ;;  %v826_v26 = vld [vmem:[%s959_s2 + $0x28] sm:$0xff] (!%p228_p3)  }
   0xa   : > { %v741_v39 = vld [vmem:[%s960_s3] ss:$0 sm:$0xff] (!%p228_p3) }
   0xc   : > { %771 = vmatpush3.bf16.msra.mxu1 (!%p228_p3), %v824_v8 }
   0xd   : > { %784 = vmatprep.subr.bf16.mxu1 (!%p228_p3), %v851_v1 }
   0xe   : > { %s968_s18 = smov (!%p277_p4, %s841_s18), 1 }
   0xf   : > { %s715_s24 = sshll.u32 %s968_s18, 2  ;;  %s744_s17 = sshll.u32 %s968_s18, 3 }
  0x10   : > { %s280_s27 = scalar_lea.vmem %s958_s1, %s715_s24  ;;  %s289_s24 = scalar_lea.vmem %s961_s4, %s744_s17 }
  0x11   : > { %v305_v2 = vld [vmem:[%s280_s27] sm:$0xf]  ;;  %s745_s27 = sshll.u32 %s968_s18, 4 }
  0x12   : > { %792 = vmatprep.subr.msk.bf16.mxu0 %vm321_vm1, %v305_v2  ;;  %v323_v3 = vsel %vm321_vm1, %v305_v2, 0  ;;  %v747_v37 = vld [vmem:[%s289_s24] sm:$0xff]   ;;  %s299_s30 = scalar_lea.vmem %s962_s5, %s745_s27 }
  0x13   : > { %763 = vmatpush3.bf16.msra.mxu0 %v323_v3  ;;  %v748_v41 = vunpack.c.l.bf16 %v747_v37  ;;  %v749_v46 = vunpack.c.h.bf16 %v747_v37 }
  0x14   : > { %776 = vmatprep.subr.bf16.mxu0 %v851_v1 }
  0x16   : > { %765 = vmatmul.mubr.msk.bf16.vlgmr.msra.gmra.mrb[0].mxu0 %vm314_vm0, %v820_v4 }
  0x17   : > { %777 = vmatpush3.bf16.msra.mxu0 %v821_v5  ;;  %780 = vmatprep.mubr.msk.bf16.mxu0 %vm852_vm2, %v851_v1 }
  0x18   : > { %778 = vmatprep.subr.bf16.mxu0 %v851_v1 }
  0x1b   : > { %779 = vmatpush3.bf16.msra.mxu0 %v822_v6 }
  0xe9   : > { %v766_v9 = vpop.f32.mrb[0].mxu0 }
  0xea   : > { %v359_v10 = vpop.f32.mrb[1].mxu0  ;;  %v374_v11 = vpack.c.bf16 %v766_v9, %v766_v9 }
  0xeb   : > { %v767_v12 = vpop.f32.mrb[2].mxu0 }
  0xec   : > { %v362_v13 = vpop.f32.mrb[3].mxu0  ;;  %v393_v15 = vshll.u32 %v374_v11, 16  ;;  %v518_v16 = vrot.slane %v374_v11, 1 }
  0xed   : > { %v373_v14 = vpack.c.bf16 %v362_v13, %v359_v10 }
  0xee   : > { %v395_v22 = vrot.slane %v393_v15, 1 }
  0xef   : > { %v388_v17 = vshll.u32 %v373_v14, 16  ;;  %v517_v18 = vrot.slane %v373_v14, 1  ;;  %781 = vmatmul.mubr.msk.bf16.vlgmr.msra.gmra.mrb[4].mxu0 %vm409_vm3, %v373_v14  ;;  %v386_v19 = vshrl.u32 %v373_v14, 16 }
  0xf1   : > { %v390_v20 = vrot.slane %v388_v17, 1  ;;  %v519_v21 = vsel %vm516_vm4, %v517_v18, %v518_v16 }
  0xf3   : > { %v391_v23 = vor.u32 %v390_v20, %v386_v19 }
  0xf5   : > { %v396_v25 = vsel %vm384_vm5, %v391_v23, %v395_v22 }
  0xf6   : > { %773 = vmatmul.mubr.msk.bf16.vlgmr.msra.gmra.mrb[0].mxu1 %vm409_vm3, %v396_v25 }
  0xf7   : > { %785 = vmatpush3.bf16.msra.mxu1 %v825_v24  ;;  %788 = vmatprep.mubr.msk.bf16.mxu1 %vm852_vm2, %v851_v1 }
  0xf8   : > { %786 = vmatprep.subr.bf16.mxu1 %v851_v1 }
  0xfb   : > { %787 = vmatpush3.bf16.msra.mxu1 %v826_v26 }
  0xfe   : > { %789 = vmatmul.mubr.msk.bf16.vlgmr.msra.gmra.mrb[4].mxu1 %vm409_vm3, %v519_v21 }
 0x1c2   : > { %v502_v27 = vpop.f32.mrb[4].mxu0 }
 0x1c3   : > { %v782_v28 = vpop.f32.mrb[5].mxu0 }
 0x1c4   : > { %v505_v29 = vpop.f32.mrb[6].mxu0 }
 0x1c5   : > { %v783_v30 = vpop.f32.mrb[7].mxu0 }
 0x1c9   : > { %v447_v31 = vpop.f32.mrb[0].mxu1 }
 0x1ca   : > { %v503_v32 = vadd.f32 %v502_v27, %v447_v31  ;;  %v774_v33 = vpop.f32.mrb[1].mxu1 }
 0x1cb   : > { %v450_v34 = vpop.f32.mrb[2].mxu1 }
 0x1cc   : > { %v506_v35 = vadd.f32 %v505_v29, %v450_v34  ;;  %v775_v36 = vpop.f32.mrb[3].mxu1 }
 0x1d1   : > { %v569_v38 = vpop.f32.mrb[4].mxu1 }
 0x1d2   : > { %v576_v40 = vadd.f32 %v569_v38, %v503_v32  ;;  %v790_v42 = vpop.f32.mrb[5].mxu1 }
 0x1d3   : > { %v572_v43 = vpop.f32.mrb[6].mxu1 }
 0x1d4   : > { %v585_v44 = vadd.f32 %v741_v39, %v576_v40  ;;  %v577_v45 = vadd.f32 %v572_v43, %v506_v35  ;;  %v791_v47 = vpop.f32.mrb[7].mxu1 }
 0x1d6   : > { %v591_v48 = vadd.f32 %v748_v41, %v585_v44  ;;  %v586_v49 = vadd.f32 %v741_v39, %v577_v45 }
 0x1d8   : > { %593 = vst [vmem:[%s299_s30] sm:$0xff] %v591_v48  ;;  %v592_v50 = vadd.f32 %v749_v46, %v586_v49 }
 0x1da   : > { %594 = vst [vmem:[%s299_s30 + $0x8] sm:$0xff] %v592_v50 }
 0x1db PF: > { %s15_s20 = sadd.s32 1, %s849_s20   ;;  %s963_s18 = smov %s845_s19 }
 0x1dc   : > { %p12_p5 = scmp.ge.s32.totalorder %s15_s20, 4   ;;  %s964_s19 = smov %s966_s21 }
 0x1de   :  { %14 = sbr.rel (!%p12_p5) target bundleno = 2 (0x2), region = 78 }

// kernel: apply_nchw.1
= control target key start
LH: loop header
LB: loop body
LE: loop exit
PB: predicated region body
PF: predicated region fallthrough
CT: control target
= control target key end

     0   :  { %s883_s18 = smov 0   ;;  %s885_s19 = smov 0   ;;  %s957_s0 = inlined_call_operand.vmem [shape: bf16[1,18,8], index: 0, kind: input, shape index: {}]   ;;  %s958_s1 = inlined_call_operand.vmem [shape: bf16[2,8,32], index: 1, kind: input, shape index: {}]   ;;  %s959_s2 = inlined_call_operand.vmem [shape: bf16[3,32,128], index: 2, kind: input, shape index: {}]   ;;  %s960_s3 = inlined_call_operand.vmem [shape: f32[1,128], index: 3, kind: input, shape index: {}]   ;;  %s961_s4 = inlined_call_operand.vmem [shape: bf16[2,16,128], index: 4, kind: input, shape index: {}]   ;;  %s962_s5 = inlined_call_operand.vmem [shape: f32[2,16,128], index: 5, kind: output, shape index: {}]  }
   0x1   :  { %s887_s20 = smov 0  }
   0x2 LB: > { %s27_s21 = sadd.s32 1, %s845_s19  ;;  %p714_p0 = scmp.ge.s32.totalorder %s849_s20, 1  ;;  %s849_s20 = sphi %s887_s20, %s15_s20   ;;  %s845_s19 = sphi %s885_s19, %s964_s19   ;;  %s841_s18 = sphi %s883_s18, %s963_s18  }
   0x3   : > { %p29_p1 = scmp.ge.s32.totalorder %s27_s21, 2  ;;  %p227_p2 = scmp.lt.s32.totalorder %s849_s20, 3 }
   0x5   : > { %s966_s21 = smov (%p29_p1, %s27_s21), 0  ;;  %p228_p3 = pnand %p714_p0, %p227_p2 }
   0x6   : > { %p277_p4 = scmp.lt.s32.totalorder (!%p228_p3), %s841_s18, 1  ;;  %v819_v0 = vld [vmem:[%s957_s0] sm:$0xff] (!%p228_p3)   ;;  %vm314_vm0 = vcmask (!%p228_p3), 64512   ;;  %v851_v1 = vmov (!%p228_p3), 0.0   ;;  %vm321_vm1 = vcmask (!%p228_p3), 1043456   ;;  %v822_v6 = vld [vmem:[%s959_s2 + $0x8] sm:$0xff] (!%p228_p3)  }
   0x7   : > { %231 = sbr.rel (%p228_p3) target bundleno = 475 (0x1db), region = 40  ;;  %768 = vmatprep.subr.bf16.mxu1 (!%p228_p3), %v851_v1  ;;  %764 = vmatprep.mubr.msk.bf16.mxu0 (!%p228_p3), %vm314_vm0, %v819_v0  ;;  %v820_v4 = vld [vmem:[%s957_s0 + $0x8] ss:$0 sps:$4 sm:$0x11] (!%p228_p3)   ;;  %v821_v5 = vld [vmem:[%s959_s2] sm:$0xff] (!%p228_p3)   ;;  %v823_v7 = vld [vmem:[%s959_s2 + $0x10] sm:$0xff] (!%p228_p3)  }
   0x8   : > { %vm852_vm2 = vmmov (!%p228_p3), 0   ;;  %769 = vmatpush3.bf16.msra.mxu1 (!%p228_p3), %v823_v7  ;;  %v824_v8 = vld [vmem:[%s959_s2 + $0x18] sm:$0xff] (!%p228_p3)   ;;  %vm409_vm3 = vcmask (!%p228_p3), 261120   ;;  %vm516_vm4 = vcmask (!%p228_p3), 1046528   ;;  %vm384_vm5 = vsmask.f32 (!%p228_p3), 7424 }
   0x9   : > { %772 = vmatprep.mubr.msk.bf16.mxu1 (!%p228_p3), %vm852_vm2, %v851_v1  ;;  %770 = vmatprep.subr.bf16.mxu1 (!%p228_p3), %v851_v1  ;;  %v825_v24 = vld [vmem:[%s959_s2 + $0x20] sm:$0xff] (!%p228_p3)   ;;  %v826_v26 = vld [vmem:[%s959_s2 + $0x28] sm:$0xff] (!%p228_p3)  }
   0xa   : > { %v741_v39 = vld [vmem:[%s960_s3] ss:$0 sm:$0xff] (!%p228_p3) }
   0xc   : > { %771 = vmatpush3.bf16.msra.mxu1 (!%p228_p3), %v824_v8 }
   0xd   : > { %784 = vmatprep.subr.bf16.mxu1 (!%p228_p3), %v851_v1 }
   0xe   : > { %s968_s18 = smov (!%p277_p4, %s841_s18), 1 }
   0xf   : > { %s715_s24 = sshll.u32 %s968_s18, 2  ;;  %s744_s17 = sshll.u32 %s968_s18, 3 }
  0x10   : > { %s280_s27 = scalar_lea.vmem %s958_s1, %s715_s24  ;;  %s289_s24 = scalar_lea.vmem %s961_s4, %s744_s17 }
  0x11   : > { %v305_v2 = vld [vmem:[%s280_s27] sm:$0xf]  ;;  %s745_s27 = sshll.u32 %s968_s18, 4 }
  0x12   : > { %792 = vmatprep.subr.msk.bf16.mxu0 %vm321_vm1, %v305_v2  ;;  %v323_v3 = vsel %vm321_vm1, %v305_v2, 0  ;;  %v747_v37 = vld [vmem:[%s289_s24] sm:$0xff]   ;;  %s299_s30 = scalar_lea.vmem %s962_s5, %s745_s27 }
  0x13   : > { %763 = vmatpush3.bf16.msra.mxu0 %v323_v3  ;;  %v748_v41 = vunpack.c.l.bf16 %v747_v37  ;;  %v749_v46 = vunpack.c.h.bf16 %v747_v37 }
  0x14   : > { %776 = vmatprep.subr.bf16.mxu0 %v851_v1 }
  0x16   : > { %765 = vmatmul.mubr.msk.bf16.vlgmr.msra.gmra.mrb[0].mxu0 %vm314_vm0, %v820_v4 }
  0x17   : > { %777 = vmatpush3.bf16.msra.mxu0 %v821_v5  ;;  %780 = vmatprep.mubr.msk.bf16.mxu0 %vm852_vm2, %v851_v1 }
  0x18   : > { %778 = vmatprep.subr.bf16.mxu0 %v851_v1 }
  0x1b   : > { %779 = vmatpush3.bf16.msra.mxu0 %v822_v6 }
  0xe9   : > { %v766_v9 = vpop.f32.mrb[0].mxu0 }
  0xea   : > { %v359_v10 = vpop.f32.mrb[1].mxu0  ;;  %v374_v11 = vpack.c.bf16 %v766_v9, %v766_v9 }
  0xeb   : > { %v767_v12 = vpop.f32.mrb[2].mxu0 }
  0xec   : > { %v362_v13 = vpop.f32.mrb[3].mxu0  ;;  %v393_v15 = vshll.u32 %v374_v11, 16  ;;  %v518_v16 = vrot.slane %v374_v11, 1 }
  0xed   : > { %v373_v14 = vpack.c.bf16 %v362_v13, %v359_v10 }
  0xee   : > { %v395_v22 = vrot.slane %v393_v15, 1 }
  0xef   : > { %v388_v17 = vshll.u32 %v373_v14, 16  ;;  %v517_v18 = vrot.slane %v373_v14, 1  ;;  %781 = vmatmul.mubr.msk.bf16.vlgmr.msra.gmra.mrb[4].mxu0 %vm409_vm3, %v373_v14  ;;  %v386_v19 = vshrl.u32 %v373_v14, 16 }
  0xf1   : > { %v390_v20 = vrot.slane %v388_v17, 1  ;;  %v519_v21 = vsel %vm516_vm4, %v517_v18, %v518_v16 }
  0xf3   : > { %v391_v23 = vor.u32 %v390_v20, %v386_v19 }
  0xf5   : > { %v396_v25 = vsel %vm384_vm5, %v391_v23, %v395_v22 }
  0xf6   : > { %773 = vmatmul.mubr.msk.bf16.vlgmr.msra.gmra.mrb[0].mxu1 %vm409_vm3, %v396_v25 }
  0xf7   : > { %785 = vmatpush3.bf16.msra.mxu1 %v825_v24  ;;  %788 = vmatprep.mubr.msk.bf16.mxu1 %vm852_vm2, %v851_v1 }
  0xf8   : > { %786 = vmatprep.subr.bf16.mxu1 %v851_v1 }
  0xfb   : > { %787 = vmatpush3.bf16.msra.mxu1 %v826_v26 }
  0xfe   : > { %789 = vmatmul.mubr.msk.bf16.vlgmr.msra.gmra.mrb[4].mxu1 %vm409_vm3, %v519_v21 }
 0x1c2   : > { %v502_v27 = vpop.f32.mrb[4].mxu0 }
 0x1c3   : > { %v782_v28 = vpop.f32.mrb[5].mxu0 }
 0x1c4   : > { %v505_v29 = vpop.f32.mrb[6].mxu0 }
 0x1c5   : > { %v783_v30 = vpop.f32.mrb[7].mxu0 }
 0x1c9   : > { %v447_v31 = vpop.f32.mrb[0].mxu1 }
 0x1ca   : > { %v503_v32 = vadd.f32 %v502_v27, %v447_v31  ;;  %v774_v33 = vpop.f32.mrb[1].mxu1 }
 0x1cb   : > { %v450_v34 = vpop.f32.mrb[2].mxu1 }
 0x1cc   : > { %v506_v35 = vadd.f32 %v505_v29, %v450_v34  ;;  %v775_v36 = vpop.f32.mrb[3].mxu1 }
 0x1d1   : > { %v569_v38 = vpop.f32.mrb[4].mxu1 }
 0x1d2   : > { %v576_v40 = vadd.f32 %v569_v38, %v503_v32  ;;  %v790_v42 = vpop.f32.mrb[5].mxu1 }
 0x1d3   : > { %v572_v43 = vpop.f32.mrb[6].mxu1 }
 0x1d4   : > { %v585_v44 = vadd.f32 %v741_v39, %v576_v40  ;;  %v577_v45 = vadd.f32 %v572_v43, %v506_v35  ;;  %v791_v47 = vpop.f32.mrb[7].mxu1 }
 0x1d6   : > { %v591_v48 = vadd.f32 %v748_v41, %v585_v44  ;;  %v586_v49 = vadd.f32 %v741_v39, %v577_v45 }
 0x1d8   : > { %593 = vst [vmem:[%s299_s30] sm:$0xff] %v591_v48  ;;  %v592_v50 = vadd.f32 %v749_v46, %v586_v49 }
 0x1da   : > { %594 = vst [vmem:[%s299_s30 + $0x8] sm:$0xff] %v592_v50 }
 0x1db PF: > { %s15_s20 = sadd.s32 1, %s849_s20   ;;  %s963_s18 = smov %s845_s19 }
 0x1dc   : > { %p12_p5 = scmp.ge.s32.totalorder %s15_s20, 4   ;;  %s964_s19 = smov %s966_s21 }
 0x1de   :  { %14 = sbr.rel (!%p12_p5) target bundleno = 2 (0x2), region = 78 }

</bundles_post_ra>
